<compile_context>
chip_gen: v7x
topology: tpu7x:2x2x1
jax: 0.10.0
libtpu: 0.0.40
codegen_flags: <defaults>
</compile_context>

<pallas_src>
import functools

import jax
import jax.numpy as jnp
from jax.experimental import pallas as pl
from jax.experimental.pallas import tpu as pltpu


def _round_up(n, m):
    return ((n + m - 1) // m) * m


def _feature_model_kernel(x_ref, w1_ref, b1_ref, w2_ref, b2_ref,
                          w3_ref, b3_ref, o_ref):
    # Fully fused forward for one batch tile; weights are VMEM-resident bf16,
    # accumulation is f32 on the MXU.
    x = x_ref[...].astype(jnp.bfloat16)

    # fc1 + ReLU
    h1 = jnp.dot(x, w1_ref[...], preferred_element_type=jnp.float32)
    h1 = jnp.maximum(h1 + b1_ref[...], 0.0)

    # fc2 + ReLU
    h2 = jnp.dot(h1.astype(jnp.bfloat16), w2_ref[...],
                 preferred_element_type=jnp.float32)
    h2 = jnp.maximum(h2 + b2_ref[...], 0.0)

    # output projection (lane-dense, padded to a multiple of 128)
    y = jnp.dot(h2.astype(jnp.bfloat16), w3_ref[...],
                preferred_element_type=jnp.float32)
    o_ref[...] = (y + b3_ref[...]).astype(o_ref.dtype)


@functools.partial(jax.jit, static_argnames=("batch_tile",))
def feature_model_forward(x, params, *, batch_tile=256):
    """x: (B, input_len) f32; params: dict of transposed bf16 weights / f32 biases."""
    w1, b1 = params["w1"], params["b1"]   # (in, 512) bf16, (1, 512) f32
    w2, b2 = params["w2"], params["b2"]   # (512, 256) bf16, (1, 256) f32
    w3, b3 = params["w3"], params["b3"]   # (256, out) bf16, (1, out) f32

    B, in_len = x.shape
    out_len = w3.shape[1]

    # Lane-dense output: pad the final projection width to a multiple of 128.
    out_pad = _round_up(out_len, 128)
    if out_pad != out_len:
        w3 = jnp.pad(w3, ((0, 0), (0, out_pad - out_len)))
        b3 = jnp.pad(b3, ((0, 0), (0, out_pad - out_len)))

    # Batch tile: multiple of 8 sublanes; pad B so the grid divides evenly.
    tb = min(batch_tile, _round_up(B, 8))
    b_pad = _round_up(B, tb)
    if b_pad != B:
        x = jnp.pad(x, ((0, b_pad - B), (0, 0)))

    grid = (b_pad // tb,)

    # Advisory cost estimate (helps XLA overlap this tiny call with neighbors).
    flops = 2 * b_pad * (in_len * 512 + 512 * 256 + 256 * out_pad)
    bytes_accessed = (
        x.size * 4
        + (w1.size + w2.size + w3.size) * 2        # bf16 weights
        + (b1.size + b2.size + b3.size) * 4        # f32 biases
        + b_pad * out_pad * 4                      # f32 output
    )
    cost = pl.CostEstimate(flops=flops, transcendentals=0,
                           bytes_accessed=bytes_accessed)

    # Weights/biases: constant block index -> stay resident across batch tiles.
    resident = lambda a: pl.BlockSpec(a.shape, lambda i: (0, 0))

    out = pl.pallas_call(
        _feature_model_kernel,
        out_shape=jax.ShapeDtypeStruct((b_pad, out_pad), jnp.float32),
        grid=grid,
        in_specs=[
            pl.BlockSpec((tb, in_len), lambda i: (i, 0)),   # x: tiled over batch
            resident(w1), resident(b1),
            resident(w2), resident(b2),
            resident(w3), resident(b3),
        ],
        out_specs=pl.BlockSpec((tb, out_pad), lambda i: (i, 0)),
        compiler_params=pltpu.CompilerParams(
            dimension_semantics=("parallel",),   # shard batch tiles across TCs (v7x)
            vmem_limit_bytes=16 << 20,           # footprint is ~1 MiB; leave headroom
        ),
        cost_estimate=cost,
    )(x, w1, b1, w2, b2, w3, b3)

    return out[:B, :out_len]


def init_params(key, input_len, output_len):
    """Deterministic synthetic init (Kaiming-uniform-ish scale like PyTorch).

    Weights are stored transposed (in, out) and in bf16; biases stay f32.
    """
    def linear(key, fan_in, fan_out):
        kw, kb = jax.random.split(key)
        bound = 1.0 / jnp.sqrt(float(fan_in))
        w = jax.random.uniform(kw, (fan_in, fan_out), jnp.float32, -bound, bound)
        b = jax.random.uniform(kb, (1, fan_out), jnp.float32, -bound, bound)
        return w.astype(jnp.bfloat16), b

    k1, k2, k3 = jax.random.split(key, 3)
    w1, b1 = linear(k1, input_len, 512)
    w2, b2 = linear(k2, 512, 256)
    w3, b3 = linear(k3, 256, output_len)
    return {"w1": w1, "b1": b1, "w2": w2, "b2": b2, "w3": w3, "b3": b3}


def feature_model_ref(x, p):
    """Pure-JAX reference mirroring the kernel numerics (bf16 inputs, f32 acc)."""
    h1 = jnp.dot(x.astype(jnp.bfloat16), p["w1"],
                 preferred_element_type=jnp.float32) + p["b1"]
    h1 = jnp.maximum(h1, 0.0)
    h2 = jnp.dot(h1.astype(jnp.bfloat16), p["w2"],
                 preferred_element_type=jnp.float32) + p["b2"]
    h2 = jnp.maximum(h2, 0.0)
    return jnp.dot(h2.astype(jnp.bfloat16), p["w3"],
                   preferred_element_type=jnp.float32) + p["b3"]


if __name__ == "__main__":
    key = jax.random.PRNGKey(0)
    k_params, k_x = jax.random.split(key)

    batch, input_len, output_len = 8, 32, 8
    params = init_params(k_params, input_len, output_len)
    x = jax.random.normal(k_x, (batch, input_len), jnp.float32)

    out = feature_model_forward(x, params)
    out = jax.block_until_ready(out)

    ref = feature_model_ref(x, params)
    assert out.shape == (batch, output_len), out.shape
    assert jnp.allclose(out, ref, atol=1e-2, rtol=1e-2), "mismatch vs reference"

    print("KERNEL_OK")
</pallas_src>

<mosaic_0001>
module attributes {stable_mosaic.version = 11 : i64} {
  func.func @_feature_model_kernel(%arg0: i32, %arg1: memref<8x32xf32, #tpu.memory_space<vmem>>, %arg2: memref<32x512xbf16, #tpu.memory_space<vmem>>, %arg3: memref<1x512xf32, #tpu.memory_space<vmem>>, %arg4: memref<512x256xbf16, #tpu.memory_space<vmem>>, %arg5: memref<1x256xf32, #tpu.memory_space<vmem>>, %arg6: memref<256x128xbf16, #tpu.memory_space<vmem>>, %arg7: memref<1x128xf32, #tpu.memory_space<vmem>>, %arg8: memref<8x128xf32, #tpu.memory_space<vmem>>) attributes {dimension_semantics = [#tpu.dimension_semantics<parallel>], iteration_bounds = array<i64: 1>, scalar_prefetch = 0 : i64, scratch_operands = 0 : i64, tpu.core_type = #tpu.core_type<tc>, window_params = [{transform_indices = @transform_0, window_bounds = array<i64: 8, 32>}, {pipeline_mode = #tpu.pipeline_mode<synchronous>, transform_indices = @transform_1, window_bounds = array<i64: 32, 512>}, {pipeline_mode = #tpu.pipeline_mode<synchronous>, transform_indices = @transform_2, window_bounds = array<i64: 1, 512>}, {pipeline_mode = #tpu.pipeline_mode<synchronous>, transform_indices = @transform_3, window_bounds = array<i64: 512, 256>}, {pipeline_mode = #tpu.pipeline_mode<synchronous>, transform_indices = @transform_4, window_bounds = array<i64: 1, 256>}, {pipeline_mode = #tpu.pipeline_mode<synchronous>, transform_indices = @transform_5, window_bounds = array<i64: 256, 128>}, {pipeline_mode = #tpu.pipeline_mode<synchronous>, transform_indices = @transform_6, window_bounds = array<i64: 1, 128>}, {transform_indices = @transform_7, window_bounds = array<i64: 8, 128>}]} {
    %c0 = arith.constant 0 : index
    %c0_0 = arith.constant 0 : index
    %0 = vector.load %arg1[%c0, %c0_0] : memref<8x32xf32, #tpu.memory_space<vmem>>, vector<8x32xf32>
    %1 = arith.truncf %0 : vector<8x32xf32> to vector<8x32xbf16>
    %c0_1 = arith.constant 0 : index
    %c0_2 = arith.constant 0 : index
    %2 = vector.load %arg2[%c0_1, %c0_2] : memref<32x512xbf16, #tpu.memory_space<vmem>>, vector<32x512xbf16>
    %cst = arith.constant dense<0.000000e+00> : vector<8x512xf32>
    %3 = tpu.matmul %1, %2, %cst {dimension_numbers = #tpu.dot_dimension_numbers<[1], [0], [0], [1], [0, 0, 1, 1], [], []>} : vector<8x32xbf16>, vector<32x512xbf16>, vector<8x512xf32> -> vector<8x512xf32>
    %c0_3 = arith.constant 0 : index
    %c0_4 = arith.constant 0 : index
    %4 = vector.load %arg3[%c0_3, %c0_4] : memref<1x512xf32, #tpu.memory_space<vmem>>, vector<1x512xf32>
    %5 = vector.broadcast %4 : vector<1x512xf32> to vector<8x512xf32>
    %6 = arith.addf %3, %5 : vector<8x512xf32>
    %cst_5 = arith.constant 0.000000e+00 : f32
    %7 = vector.broadcast %cst_5 : f32 to vector<8x512xf32>
    %8 = arith.maximumf %6, %7 : vector<8x512xf32>
    %9 = arith.truncf %8 : vector<8x512xf32> to vector<8x512xbf16>
    %c0_6 = arith.constant 0 : index
    %c0_7 = arith.constant 0 : index
    %10 = vector.load %arg4[%c0_6, %c0_7] : memref<512x256xbf16, #tpu.memory_space<vmem>>, vector<512x256xbf16>
    %cst_8 = arith.constant dense<0.000000e+00> : vector<8x256xf32>
    %11 = tpu.matmul %9, %10, %cst_8 {dimension_numbers = #tpu.dot_dimension_numbers<[1], [0], [0], [1], [0, 0, 1, 1], [], []>} : vector<8x512xbf16>, vector<512x256xbf16>, vector<8x256xf32> -> vector<8x256xf32>
    %c0_9 = arith.constant 0 : index
    %c0_10 = arith.constant 0 : index
    %12 = vector.load %arg5[%c0_9, %c0_10] : memref<1x256xf32, #tpu.memory_space<vmem>>, vector<1x256xf32>
    %13 = vector.broadcast %12 : vector<1x256xf32> to vector<8x256xf32>
    %14 = arith.addf %11, %13 : vector<8x256xf32>
    %cst_11 = arith.constant 0.000000e+00 : f32
    %15 = vector.broadcast %cst_11 : f32 to vector<8x256xf32>
    %16 = arith.maximumf %14, %15 : vector<8x256xf32>
    %17 = arith.truncf %16 : vector<8x256xf32> to vector<8x256xbf16>
    %c0_12 = arith.constant 0 : index
    %c0_13 = arith.constant 0 : index
    %18 = vector.load %arg6[%c0_12, %c0_13] : memref<256x128xbf16, #tpu.memory_space<vmem>>, vector<256x128xbf16>
    %cst_14 = arith.constant dense<0.000000e+00> : vector<8x128xf32>
    %19 = tpu.matmul %17, %18, %cst_14 {dimension_numbers = #tpu.dot_dimension_numbers<[1], [0], [0], [1], [0, 0, 1, 1], [], []>} : vector<8x256xbf16>, vector<256x128xbf16>, vector<8x128xf32> -> vector<8x128xf32>
    %c0_15 = arith.constant 0 : index
    %c0_16 = arith.constant 0 : index
    %20 = vector.load %arg7[%c0_15, %c0_16] : memref<1x128xf32, #tpu.memory_space<vmem>>, vector<1x128xf32>
    %21 = vector.broadcast %20 : vector<1x128xf32> to vector<8x128xf32>
    %22 = arith.addf %19, %21 : vector<8x128xf32>
    %c0_17 = arith.constant 0 : index
    %c0_18 = arith.constant 0 : index
    %23 = vector.load %arg8[%c0_17, %c0_18] : memref<8x128xf32, #tpu.memory_space<vmem>>, vector<8x128xf32>
    tpu.vector_store %arg8[%c0_17, %c0_18], %22 {strides = array<i32>} : memref<8x128xf32, #tpu.memory_space<vmem>>, vector<8x128xf32>,
    return
  }
  func.func @transform_0(%arg0: i32) -> (i32, i32) {
    %c0_i32 = arith.constant 0 : i32
    %c0_i32_0 = arith.constant 0 : i32
    return %arg0, %c0_i32 : i32, i32
  }
  func.func @transform_1(%arg0: i32) -> (i32, i32) {
    %c0_i32 = arith.constant 0 : i32
    %c0_i32_0 = arith.constant 0 : i32
    %c0_i32_1 = arith.constant 0 : i32
    return %c0_i32, %c0_i32_0 : i32, i32
  }
  func.func @transform_2(%arg0: i32) -> (i32, i32) {
    %c0_i32 = arith.constant 0 : i32
    %c0_i32_0 = arith.constant 0 : i32
    %c0_i32_1 = arith.constant 0 : i32
    return %c0_i32, %c0_i32_0 : i32, i32
  }
  func.func @transform_3(%arg0: i32) -> (i32, i32) {
    %c0_i32 = arith.constant 0 : i32
    %c0_i32_0 = arith.constant 0 : i32
    %c0_i32_1 = arith.constant 0 : i32
    return %c0_i32, %c0_i32_0 : i32, i32
  }
  func.func @transform_4(%arg0: i32) -> (i32, i32) {
    %c0_i32 = arith.constant 0 : i32
    %c0_i32_0 = arith.constant 0 : i32
    %c0_i32_1 = arith.constant 0 : i32
    return %c0_i32, %c0_i32_0 : i32, i32
  }
  func.func @transform_5(%arg0: i32) -> (i32, i32) {
    %c0_i32 = arith.constant 0 : i32
    %c0_i32_0 = arith.constant 0 : i32
    %c0_i32_1 = arith.constant 0 : i32
    return %c0_i32, %c0_i32_0 : i32, i32
  }
  func.func @transform_6(%arg0: i32) -> (i32, i32) {
    %c0_i32 = arith.constant 0 : i32
    %c0_i32_0 = arith.constant 0 : i32
    %c0_i32_1 = arith.constant 0 : i32
    return %c0_i32, %c0_i32_0 : i32, i32
  }
  func.func @transform_7(%arg0: i32) -> (i32, i32) {
    %c0_i32 = arith.constant 0 : i32
    %c0_i32_0 = arith.constant 0 : i32
    return %arg0, %c0_i32 : i32, i32
  }
}

</mosaic_0001>

<bundles_post_ra>
// kernel: feature_model_forward.1
= control target key start
LH: loop header
LB: loop body
LE: loop exit
PB: predicated region body
PF: predicated region fallthrough
CT: control target
= control target key end

     0   :  { %12 = vsyncpa [#allocation3], 0  ;;  %s1344_s0 = inlined_call_operand.vmem [shape: f32[8,32], index: 0, kind: input, shape index: {}]   ;;  %s1345_s1 = inlined_call_operand.vmem [shape: bf16[32,512], index: 1, kind: input, shape index: {}]   ;;  %s1346_s2 = inlined_call_operand.vmem [shape: f32[1,512], index: 2, kind: input, shape index: {}]   ;;  %s1347_s3 = inlined_call_operand.hbm [shape: bf16[512,256], index: 3, kind: input, shape index: {}]   ;;  %s1348_s4 = inlined_call_operand.vmem [shape: f32[1,256], index: 4, kind: input, shape index: {}]   ;;  %s1349_s5 = inlined_call_operand.vmem [shape: bf16[256,128], index: 5, kind: input, shape index: {}]   ;;  %s1350_s6 = inlined_call_operand.vmem [shape: f32[1,128], index: 6, kind: input, shape index: {}]   ;;  %s1351_s7 = inlined_call_operand.hbm [shape: f32[8,128], index: 7, kind: output, shape index: {}]  }
   0x1   :  { %13 = vsyncpa [#allocation4], 0  ;;  %s1175_s24 = smov [#allocation2]   ;;  %s1127_s28 = scalar_lea.hbm %s1347_s3, 8192 }
   0x2   :  { %s25_s25 = sshll.u32 %s1175_s24, 4  ;;  %p1128_p0 = scmp.ne.s32.totalorder %s1347_s3, %s1127_s28  ;;  %s26_s25 = int_to_ptr.vmem [resolvable:$true] %s25_s25 }
   0x3   :  { %p1131_p1 = scmp.lt.u32.totalorder %s1127_s28, %s1347_s3 }
   0x5   :  { %p1133_p2 = pnand %p1131_p1, %p1128_p0 }
   0x7   :  { %1136 = shalt.err (!%p1133_p2)
}
   0x8   :  { %s1137_s10 = scalar_lea.vmem %s26_s25, 8192  ;;  %p1142_p4 = scmp.lt.s32.totalorder %s26_s25, %s26_s25 }
   0x9   :  { %p1138_p3 = scmp.ne.s32.totalorder %s26_s25, %s1137_s10  ;;  %p1143_p5 = scmp.lt.s32.totalorder %s1137_s10, %s1137_s10 }
   0xb   :  { %p1144_p6 = por %p1143_p5, %p1142_p4 }
   0xd   :  { %p1145_p7 = pnand %p1144_p6, %p1138_p3 }
   0xf   :  { %1148 = shalt.err (!%p1145_p7)
}
  0x10   :  { %s1176_s11 = smov 128   ;;  %s1177_s12 = smov 8  }
  0x11   :  { %31 = dma.hbm_to_vmem [thread:$0]  %s1347_s3, 8192, %s26_s25, [#allocation3], %s1176_s11, %s1176_s11, %s1177_s12  }
  0x12   :  { %1171 = dma.done.wait [#allocation3], 8192  }
  0x13   :  { %1172 = vsyncadd [#allocation3], 4294959104  ;;  %v1178_v0 = vmov 0   ;;  %v1003_v1 = vld [vmem:[%s1345_s1 + $0x4] ss:$16 sps:$4 sm:$0xff]   ;;  %vm114_vm0 = vcmask 261120  }
  0x14   :  { %150 = vmatprep.mubr.bf16.mxu0 %v1178_v0  ;;  %v1005_v2 = vld [vmem:[%s1345_s1] ss:$16 sps:$4 sm:$0xff]   ;;  %118 = vmatprep.subr.bf16.mxu0 %v1003_v1  ;;  %v1006_v3 = vld [vmem:[%s1345_s1 + $0x24] ss:$16 sps:$4 sm:$0xff]   ;;  %v1011_v6 = vld [vmem:[%s1345_s1 + $0xc] ss:$16 sps:$4 sm:$0xff]  }
  0x15   :  { %v1008_v4 = vld [vmem:[%s1345_s1 + $0x20] ss:$16 sps:$4 sm:$0xff]   ;;  %119 = vmatpush1.bf16.msra.mxu0 %v1005_v2  ;;  %v1009_v7 = vld [vmem:[%s1345_s1 + $0x8] ss:$16 sps:$4 sm:$0xff]   ;;  %v1015_v9 = vld [vmem:[#allocation2 + $0x4] ss:$8 sps:$4 sm:$0xff]  }
  0x16   :  { %v42_v5 = vld [vmem:[%s1344_s0] sm:$0xff]  ;;  %120 = vmatprep.subr.bf16.mxu0 %v1006_v3  ;;  %v1018_v11 = vld [vmem:[#allocation2 + $0x14] ss:$8 sps:$4 sm:$0xff]   ;;  %604 = vmatprep.subr.bf16.mxu1 %v1015_v9  ;;  %v1020_v13 = vld [vmem:[#allocation2 + $0x10] ss:$8 sps:$4 sm:$0xff]   ;;  %s1179_s15 = smov [#allocation5]  }
  0x17   :  { %v43_v8 = vpack.c.bf16 %v42_v5, %v42_v5  ;;  %v1017_v10 = vld [vmem:[#allocation2] ss:$8 sps:$4 sm:$0xff]   ;;  %v1014_v12 = vld [vmem:[%s1345_s1 + $0x2c] ss:$16 sps:$4 sm:$0xff]   ;;  %v1032_v21 = vld [vmem:[#allocation2 + $0x30] ss:$8 sps:$4 sm:$0xff]  }
  0x18   :  { %605 = vmatpush1.bf16.msra.mxu1 %v1017_v10  ;;  %v1021_v14 = vld [vmem:[#allocation2 + $0x24] ss:$8 sps:$4 sm:$0xff]   ;;  %v1012_v15 = vld [vmem:[%s1345_s1 + $0x28] ss:$16 sps:$4 sm:$0xff]   ;;  %v1027_v18 = vld [vmem:[#allocation2 + $0x34] ss:$8 sps:$4 sm:$0xff]  }
  0x19   :  { %121 = vmatpush1.bf16.msra.mxu0 %v1008_v4  ;;  %606 = vmatprep.subr.bf16.mxu1 %v1018_v11  ;;  %v1025_v16 = vld [vmem:[#allocation2 + $0x104] ss:$8 sps:$4 sm:$0xff]   ;;  %v1026_v17 = vld [vmem:[#allocation2 + $0x20] ss:$8 sps:$4 sm:$0xff]   ;;  %v1031_v20 = vld [vmem:[#allocation2 + $0x114] ss:$8 sps:$4 sm:$0xff]  }
  0x1a   :  { %159 = vmatprep.subr.bf16.mxu0 %v1011_v6  ;;  %v1023_v19 = vld [vmem:[#allocation2 + $0x100] ss:$8 sps:$4 sm:$0xff]   ;;  %v1033_v22 = vld [vmem:[#allocation2 + $0x44] ss:$8 sps:$4 sm:$0xff]   ;;  %v1029_v23 = vld [vmem:[#allocation2 + $0x110] ss:$8 sps:$4 sm:$0xff]  }
  0x1b   :  { %v1037_v24 = vld [vmem:[#allocation2 + $0x124] ss:$8 sps:$4 sm:$0xff]   ;;  %v1038_v25 = vld [vmem:[#allocation2 + $0x40] ss:$8 sps:$4 sm:$0xff]   ;;  %v1039_v26 = vld [vmem:[#allocation2 + $0x54] ss:$8 sps:$4 sm:$0xff]  }
  0x1c   :  { %889 = vmatmul.mubr.msk.bf16.vlgmr.msra.gmra.mrb[0].mxu0 %vm114_vm0, %v43_v8  ;;  %607 = vmatpush1.bf16.msra.mxu1 %v1020_v13  ;;  %v1035_v27 = vld [vmem:[#allocation2 + $0x120] ss:$8 sps:$4 sm:$0xff]   ;;  %v1043_v28 = vld [vmem:[#allocation2 + $0x134] ss:$8 sps:$4 sm:$0xff]   ;;  %v1044_v29 = vld [vmem:[#allocation2 + $0x50] ss:$8 sps:$4 sm:$0xff]  }
  0x1d   :  { %160 = vmatpush1.bf16.msra.mxu0 %v1009_v7  ;;  %191 = vmatprep.mubr.bf16.mxu0 %v1178_v0  ;;  %v1045_v30 = vld [vmem:[#allocation2 + $0x64] ss:$8 sps:$4 sm:$0xff]   ;;  %v1041_v31 = vld [vmem:[#allocation2 + $0x130] ss:$8 sps:$4 sm:$0xff]   ;;  %v1050_v33 = vld [vmem:[#allocation2 + $0x60] ss:$8 sps:$4 sm:$0xff]  }
  0x1e   :  { %161 = vmatprep.subr.bf16.mxu0 %v1014_v12  ;;  %608 = vmatprep.subr.bf16.mxu1 %v1021_v14  ;;  %v1049_v32 = vld [vmem:[#allocation2 + $0x144] ss:$8 sps:$4 sm:$0xff]   ;;  %v1051_v34 = vld [vmem:[#allocation2 + $0x74] ss:$8 sps:$4 sm:$0xff]   ;;  %v1047_v35 = vld [vmem:[#allocation2 + $0x140] ss:$8 sps:$4 sm:$0xff]   ;;  %v54_v12 = vlaneseq }
  0x1f   :  { %v1055_v36 = vld [vmem:[#allocation2 + $0x154] ss:$8 sps:$4 sm:$0xff]   ;;  %v1056_v37 = vld [vmem:[#allocation2 + $0x70] ss:$8 sps:$4 sm:$0xff]   ;;  %v1057_v38 = vld [vmem:[#allocation2 + $0x84] ss:$8 sps:$4 sm:$0xff]  }
  0x20   :  { %609 = vmatpush1.bf16.msra.mxu1 %v1026_v17  ;;  %v1053_v39 = vld [vmem:[#allocation2 + $0x150] ss:$8 sps:$4 sm:$0xff]   ;;  %v1061_v40 = vld [vmem:[#allocation2 + $0x164] ss:$8 sps:$4 sm:$0xff]   ;;  %v1062_v41 = vld [vmem:[#allocation2 + $0x80] ss:$8 sps:$4 sm:$0xff]  }
  0x21   :  { %162 = vmatpush1.bf16.msra.mxu0 %v1012_v15  ;;  %610 = vmatprep.subr.bf16.mxu1 %v1027_v18  ;;  %v1063_v42 = vld [vmem:[#allocation2 + $0x94] ss:$8 sps:$4 sm:$0xff]   ;;  %v1059_v43 = vld [vmem:[#allocation2 + $0x160] ss:$8 sps:$4 sm:$0xff]   ;;  %v1068_v45 = vld [vmem:[#allocation2 + $0x90] ss:$8 sps:$4 sm:$0xff]  }
  0x22   :  { %645 = vmatprep.subr.bf16.mxu0 %v1025_v16  ;;  %v1067_v44 = vld [vmem:[#allocation2 + $0x174] ss:$8 sps:$4 sm:$0xff]   ;;  %v1069_v46 = vld [vmem:[#allocation2 + $0xa4] ss:$8 sps:$4 sm:$0xff]   ;;  %v1065_v47 = vld [vmem:[#allocation2 + $0x170] ss:$8 sps:$4 sm:$0xff]  }
  0x23   :  { %v1073_v48 = vld [vmem:[#allocation2 + $0x184] ss:$8 sps:$4 sm:$0xff]   ;;  %v1074_v49 = vld [vmem:[#allocation2 + $0xa0] ss:$8 sps:$4 sm:$0xff]   ;;  %v1075_v50 = vld [vmem:[#allocation2 + $0xb4] ss:$8 sps:$4 sm:$0xff]  }
  0x24   :  { %890 = vmatmul.mubr.msk.bf16.vlgmr.msra.gmra.mrb[4].mxu0 %vm114_vm0, %v43_v8  ;;  %611 = vmatpush1.bf16.msra.mxu1 %v1032_v21  ;;  %v1071_v51 = vld [vmem:[#allocation2 + $0x180] ss:$8 sps:$4 sm:$0xff]   ;;  %v1079_v52 = vld [vmem:[#allocation2 + $0x194] ss:$8 sps:$4 sm:$0xff]   ;;  %v1080_v53 = vld [vmem:[#allocation2 + $0xb0] ss:$8 sps:$4 sm:$0xff]  }
  0x25   :  { %646 = vmatpush1.bf16.msra.mxu0 %v1023_v19  ;;  %612 = vmatprep.subr.bf16.mxu1 %v1033_v22  ;;  %v1081_v54 = vld [vmem:[#allocation2 + $0xc4] ss:$8 sps:$4 sm:$0xff]   ;;  %v1077_v55 = vld [vmem:[#allocation2 + $0x190] ss:$8 sps:$4 sm:$0xff]   ;;  %v1086_v57 = vld [vmem:[#allocation2 + $0xc0] ss:$8 sps:$4 sm:$0xff]  }
  0x26   :  { %647 = vmatprep.subr.bf16.mxu0 %v1031_v20  ;;  %v1085_v56 = vld [vmem:[#allocation2 + $0x1a4] ss:$8 sps:$4 sm:$0xff]   ;;  %v1087_v58 = vld [vmem:[#allocation2 + $0xd4] ss:$8 sps:$4 sm:$0xff]   ;;  %v1083_v59 = vld [vmem:[#allocation2 + $0x1a0] ss:$8 sps:$4 sm:$0xff]  }
  0x27   :  { %v1091_v60 = vld [vmem:[#allocation2 + $0x1b4] ss:$8 sps:$4 sm:$0xff]   ;;  %v1092_v61 = vld [vmem:[#allocation2 + $0xd0] ss:$8 sps:$4 sm:$0xff]   ;;  %v1093_v63 = vld [vmem:[#allocation2 + $0xe4] ss:$8 sps:$4 sm:$0xff]  }
  0x28   :  { %613 = vmatpush1.bf16.msra.mxu1 %v1038_v25  ;;  %v1089_v62 = vld [vmem:[#allocation2 + $0x1b0] ss:$8 sps:$4 sm:$0xff]   ;;  %v1097_v0 = vld [vmem:[#allocation2 + $0x1c4] ss:$8 sps:$4 sm:$0xff]   ;;  %v1095_v1 = vld [vmem:[#allocation2 + $0x1c0] ss:$8 sps:$4 sm:$0xff]  }
  0x29   :  { %648 = vmatpush1.bf16.msra.mxu0 %v1029_v23  ;;  %614 = vmatprep.subr.bf16.mxu1 %v1039_v26  ;;  %v1098_v2 = vld [vmem:[#allocation2 + $0xe0] ss:$8 sps:$4 sm:$0xff]   ;;  %v1099_v3 = vld [vmem:[#allocation2 + $0xf4] ss:$8 sps:$4 sm:$0xff]   ;;  %v1101_v5 = vld [vmem:[#allocation2 + $0x1d0] ss:$8 sps:$4 sm:$0xff]  }
  0x2a   :  { %649 = vmatprep.subr.bf16.mxu0 %v1037_v24  ;;  %v1103_v4 = vld [vmem:[#allocation2 + $0x1d4] ss:$8 sps:$4 sm:$0xff]   ;;  %v1104_v6 = vld [vmem:[#allocation2 + $0xf0] ss:$8 sps:$4 sm:$0xff]   ;;  %v1107_v7 = vld [vmem:[#allocation2 + $0x1e4] ss:$8 sps:$4 sm:$0xff]  }
  0x2b   :  { %v1105_v8 = vld [vmem:[#allocation2 + $0x1e0] ss:$8 sps:$4 sm:$0xff]   ;;  %v1110_v9 = vld [vmem:[#allocation2 + $0x1f4] ss:$8 sps:$4 sm:$0xff]   ;;  %v1108_v10 = vld [vmem:[#allocation2 + $0x1f0] ss:$8 sps:$4 sm:$0xff]  }
  0x2c   :  { %615 = vmatpush1.bf16.msra.mxu1 %v1044_v29  ;;  %v1111_v11 = vld [vmem:[%s1349_s5 + $0x40] sm:$0xff]   ;;  %v1264_v13 = vshrl.u32 %v54_v12, 7  ;;  %s872_s16 = sshll.u32 %s1179_s15, 4  ;;  %s873_s16 = int_to_ptr.vmem [resolvable:$true] %s872_s16 }
  0x2d   :  { %650 = vmatpush1.bf16.msra.mxu0 %v1035_v27  ;;  %616 = vmatprep.subr.bf16.mxu1 %v1045_v30  ;;  %v52_v15 = vld [vmem:[%s1346_s2] sm:$0xf]  ;;  %s1149_s17 = scalar_lea.vmem %s873_s16, 128  ;;  %p1154_p9 = scmp.lt.s32.totalorder %s873_s16, %s873_s16 }
  0x2e   :  { %651 = vmatprep.subr.bf16.mxu0 %v1043_v28  ;;  %v56_v14 = vsub.s32 0, %v1264_v13  ;;  %v60_v16 = vsub.s32 1, %v1264_v13  ;;  %v64_v22 = vsub.s32 2, %v1264_v13  ;;  %v68_v25 = vsub.s32 3, %v1264_v13  ;;  %v955_v13 = vld [vmem:[%s1350_s6] ss:$0 sm:$0xff]  ;;  %p1150_p8 = scmp.ne.s32.totalorder %s873_s16, %s1149_s17  ;;  %p1155_p10 = scmp.lt.s32.totalorder %s1149_s17, %s1149_s17 }
  0x30   :  { %617 = vmatpush1.bf16.msra.mxu1 %v1050_v33  ;;  %v57_v17 = vrot.slane %v52_v15, %v56_v14  ;;  %v61_v18 = vrot.slane %v52_v15, %v60_v16  ;;  %v65_v29 = vrot.slane %v52_v15, %v64_v22  ;;  %p1156_p11 = por %p1155_p10, %p1154_p9 }
  0x31   :  { %652 = vmatpush1.bf16.msra.mxu0 %v1041_v31  ;;  %618 = vmatprep.subr.bf16.mxu1 %v1051_v34  ;;  %v69_v31 = vrot.slane %v52_v15, %v68_v25  ;;  %v1113_v34 = vld [vmem:[%s1349_s5 + $0x48] sm:$0xff]  }
  0x32   :  { %653 = vmatprep.subr.bf16.mxu0 %v1049_v32  ;;  %v1112_v32 = vld [vmem:[%s1349_s5] sm:$0xff]   ;;  %p1157_p12 = pnand %p1156_p11, %p1150_p8 }
  0x34   :  { %619 = vmatpush1.bf16.msra.mxu1 %v1056_v37 }
  0x35   :  { %654 = vmatpush1.bf16.msra.mxu0 %v1047_v35  ;;  %620 = vmatprep.subr.bf16.mxu1 %v1057_v38 }
  0x36   :  { %655 = vmatprep.subr.bf16.mxu0 %v1055_v36 }
  0x38   :  { %621 = vmatpush1.bf16.msra.mxu1 %v1062_v41 }
  0x39   :  { %656 = vmatpush1.bf16.msra.mxu0 %v1053_v39  ;;  %622 = vmatprep.subr.bf16.mxu1 %v1063_v42 }
  0x3a   :  { %657 = vmatprep.subr.bf16.mxu0 %v1061_v40  ;;  %v1114_v40 = vld [vmem:[%s1349_s5 + $0x8] sm:$0xff]  }
  0x3c   :  { %623 = vmatpush1.bf16.msra.mxu1 %v1068_v45 }
  0x3d   :  { %658 = vmatpush1.bf16.msra.mxu0 %v1059_v43  ;;  %624 = vmatprep.subr.bf16.mxu1 %v1069_v46  ;;  %v1115_v43 = vld [vmem:[%s1349_s5 + $0x50] sm:$0xff]  }
  0x3e   :  { %659 = vmatprep.subr.bf16.mxu0 %v1067_v44  ;;  %v1116_v46 = vld [vmem:[%s1349_s5 + $0x10] sm:$0xff]  }
  0x40   :  { %625 = vmatpush1.bf16.msra.mxu1 %v1074_v49  ;;  %v1118_v49 = vld [vmem:[%s1349_s5 + $0x18] sm:$0xff]  }
  0x41   :  { %660 = vmatpush1.bf16.msra.mxu0 %v1065_v47  ;;  %626 = vmatprep.subr.bf16.mxu1 %v1075_v50  ;;  %v1119_v50 = vld [vmem:[%s1349_s5 + $0x60] sm:$0xff]  }
  0x42   :  { %661 = vmatprep.subr.bf16.mxu0 %v1073_v48  ;;  %v1117_v48 = vld [vmem:[%s1349_s5 + $0x58] sm:$0xff]  }
  0x44   :  { %627 = vmatpush1.bf16.msra.mxu1 %v1080_v53  ;;  %v1122_v53 = vld [vmem:[%s1349_s5 + $0x28] sm:$0xff]  }
  0x45   :  { %662 = vmatpush1.bf16.msra.mxu0 %v1071_v51  ;;  %628 = vmatprep.subr.bf16.mxu1 %v1081_v54  ;;  %v1120_v51 = vld [vmem:[%s1349_s5 + $0x20] sm:$0xff]   ;;  %v1123_v54 = vld [vmem:[%s1349_s5 + $0x70] sm:$0xff]  }
  0x46   :  { %663 = vmatprep.subr.bf16.mxu0 %v1079_v52  ;;  %v1121_v52 = vld [vmem:[%s1349_s5 + $0x68] sm:$0xff]  }
  0x48   :  { %629 = vmatpush1.bf16.msra.mxu1 %v1086_v57  ;;  %v1126_v57 = vld [vmem:[%s1349_s5 + $0x38] sm:$0xff]  }
  0x49   :  { %664 = vmatpush1.bf16.msra.mxu0 %v1077_v55  ;;  %630 = vmatprep.subr.bf16.mxu1 %v1087_v58  ;;  %v1124_v55 = vld [vmem:[%s1349_s5 + $0x30] sm:$0xff]   ;;  %v272_v58 = vld [vmem:[%s1348_s4] sm:$0x3] }
  0x4a   :  { %665 = vmatprep.subr.bf16.mxu0 %v1085_v56  ;;  %v1125_v56 = vld [vmem:[%s1349_s5 + $0x78] sm:$0xff]  }
  0x4c   :  { %631 = vmatpush1.bf16.msra.mxu1 %v1092_v61 }
  0x4d   :  { %666 = vmatpush1.bf16.msra.mxu0 %v1083_v59  ;;  %632 = vmatprep.subr.bf16.mxu1 %v1093_v63 }
  0x4e   :  { %667 = vmatprep.subr.bf16.mxu0 %v1091_v60 }
  0x50   :  { %633 = vmatpush1.bf16.msra.mxu1 %v1098_v2 }
  0x51   :  { %668 = vmatpush1.bf16.msra.mxu0 %v1089_v62  ;;  %634 = vmatprep.subr.bf16.mxu1 %v1099_v3  ;;  %v277_v62 = vrot.slane %v272_v58, %v56_v14 }
  0x52   :  { %669 = vmatprep.subr.bf16.mxu0 %v1097_v0  ;;  %v281_v0 = vrot.slane %v272_v58, %v60_v16 }
  0x54   :  { %635 = vmatpush1.bf16.msra.mxu1 %v1104_v6 }
  0x55   :  { %670 = vmatpush1.bf16.msra.mxu0 %v1095_v1  ;;  %972 = vmatprep.subr.bf16.mxu1 %v1111_v11 }
  0x56   :  { %671 = vmatprep.subr.bf16.mxu0 %v1103_v4 }
  0x59   :  { %672 = vmatpush1.bf16.msra.mxu0 %v1101_v5 }
  0x5a   :  { %673 = vmatprep.subr.bf16.mxu0 %v1107_v7 }
  0x5d   :  { %674 = vmatpush1.bf16.msra.mxu0 %v1105_v8 }
  0x5e   :  { %675 = vmatprep.subr.bf16.mxu0 %v1110_v9 }
  0x61   :  { %676 = vmatpush1.bf16.msra.mxu0 %v1108_v10 }
  0xef   :  { %v152_v19 = vpop.f32.mrb[0].mxu0 }
  0xf0   :  { %v153_v20 = vadd.f32 %v152_v19, %v57_v17  ;;  %v154_v21 = vpop.f32.mrb[1].mxu0 }
  0xf1   :  { %v155_v23 = vadd.f32 %v154_v21, %v61_v18  ;;  %v156_v24 = vpop.f32.mrb[2].mxu0 }
  0xf2   :  { %v200_v26 = vmax.f32 %v153_v20, 0.0  ;;  %v157_v27 = vpop.f32.mrb[3].mxu0 }
  0xf3   :  { %v201_v28 = vmax.f32 %v155_v23, 0.0 }
  0xf4   :  { %v204_v33 = vpack.c.bf16 %v200_v26, %v200_v26 }
  0xf5   :  { %v205_v30 = vpack.c.bf16 %v201_v28, %v201_v28 }
  0xf7   :  { %v193_v35 = vpop.f32.mrb[4].mxu0  ;;  %636 = vmatprep.mubr.bf16.mxu1 %v205_v30 }
  0xf8   :  { %v194_v36 = vadd.f32 %v193_v35, %v65_v29  ;;  %v195_v37 = vpop.f32.mrb[5].mxu0  ;;  %637 = vmatmul.mubr.bf16.vlgmr.msra.gmra.mrb[0].mxu1 %v204_v33 }
  0xf9   :  { %v196_v38 = vadd.f32 %v195_v37, %v69_v31  ;;  %v197_v39 = vpop.f32.mrb[6].mxu0  ;;  %973 = vmatpush3.bf16.msra.mxu1 %v1112_v32 }
  0xfa   :  { %v202_v41 = vmax.f32 %v194_v36, 0.0  ;;  %v198_v42 = vpop.f32.mrb[7].mxu0  ;;  %974 = vmatprep.subr.bf16.mxu1 %v1113_v34 }
  0xfb   :  { %v203_v44 = vmax.f32 %v196_v38, 0.0 }
  0xfc   :  { %v206_v47 = vpack.c.bf16 %v202_v41, %v202_v41 }
  0xfd   :  { %v207_v45 = vpack.c.bf16 %v203_v44, %v203_v44  ;;  %975 = vmatpush3.bf16.msra.mxu1 %v1114_v40 }
  0xfe   :  { %976 = vmatprep.subr.bf16.mxu1 %v1115_v43 }
  0xff   :  { %677 = vmatprep.mubr.bf16.mxu0 %v207_v45 }
 0x100   :  { %678 = vmatmul.mubr.bf16.vlgmr.msra.gmra.mrb[8].mxu0 %v206_v47 }
 0x101   :  { %977 = vmatpush3.bf16.msra.mxu1 %v1116_v46 }
 0x102   :  { %978 = vmatprep.subr.bf16.mxu1 %v1117_v48 }
 0x105   :  { %979 = vmatpush3.bf16.msra.mxu1 %v1118_v49 }
 0x106   :  { %980 = vmatprep.subr.bf16.mxu1 %v1119_v50 }
 0x109   :  { %981 = vmatpush3.bf16.msra.mxu1 %v1120_v51 }
 0x10a   :  { %982 = vmatprep.subr.bf16.mxu1 %v1121_v52 }
 0x10d   :  { %983 = vmatpush3.bf16.msra.mxu1 %v1122_v53 }
 0x10e   :  { %984 = vmatprep.subr.bf16.mxu1 %v1123_v54 }
 0x111   :  { %985 = vmatpush3.bf16.msra.mxu1 %v1124_v55 }
 0x112   :  { %986 = vmatprep.subr.bf16.mxu1 %v1125_v56 }
 0x115   :  { %987 = vmatpush3.bf16.msra.mxu1 %v1126_v57 }
 0x1cb   :  { %v638_v59 = vpop.f32.mrb[0].mxu1 }
 0x1cc   :  { %v640_v60 = vpop.f32.mrb[1].mxu1  ;;  %v639_v1 = vadd.f32 %v638_v59, %v277_v62 }
 0x1cd   :  { %v642_v61 = vpop.f32.mrb[2].mxu1  ;;  %v641_v2 = vadd.f32 %v640_v60, %v281_v0 }
 0x1ce   :  { %v643_v63 = vpop.f32.mrb[3].mxu1 }
 0x1d3   :  { %v679_v3 = vpop.f32.mrb[8].mxu0 }
 0x1d4   :  { %v680_v4 = vadd.f32 %v679_v3, %v639_v1  ;;  %v681_v5 = vpop.f32.mrb[9].mxu0 }
 0x1d5   :  { %v682_v6 = vadd.f32 %v681_v5, %v641_v2  ;;  %v683_v7 = vpop.f32.mrb[10].mxu0 }
 0x1d6   :  { %v686_v8 = vmax.f32 %v680_v4, 0.0  ;;  %v684_v9 = vpop.f32.mrb[11].mxu0 }
 0x1d7   :  { %v687_v10 = vmax.f32 %v682_v6, 0.0 }
 0x1d8   :  { %v688_v12 = vpack.c.bf16 %v686_v8, %v686_v8 }
 0x1d9   :  { %v689_v11 = vpack.c.bf16 %v687_v10, %v687_v10 }
 0x1db   :  { %857 = vmatprep.mubr.bf16.mxu1 %v689_v11 }
 0x1dc   :  { %858 = vmatmul.mubr.bf16.vlgmr.msra.gmra.mrb[4].mxu1 %v688_v12 }
 0x2af   :  { %v988_v15 = vpop.f32.mrb[4].mxu1 }
 0x2b0   :  { %v989_v14 = vpop.f32.mrb[5].mxu1 }
 0x2b1   :  { %v990_v16 = vadd.f32 %v989_v14, %v988_v15  ;;  %v991_v17 = vpop.f32.mrb[6].mxu1 }
 0x2b2   :  { %v992_v18 = vpop.f32.mrb[7].mxu1 }
 0x2b3   :  { %v860_v19 = vadd.f32 %v990_v16, %v955_v13 }
 0x2b5   :  { %865 = vst [vmem:[#allocation5] sm:$0xff] %v860_v19 }
 0x2b6   :  { %1160 = shalt.err (!%p1157_p12)
}
 0x2b7   :  { %s1161_s6 = scalar_lea.hbm %s1351_s7, 128 }
 0x2b8   :  { %p1162_p13 = scmp.ne.s32.totalorder %s1351_s7, %s1161_s6  ;;  %p1165_p0 = scmp.lt.u32.totalorder %s1161_s6, %s1351_s7 }
 0x2ba   :  { %p1167_p1 = pnand %p1165_p0, %p1162_p13 }
 0x2bc   :  { %1170 = shalt.err (!%p1167_p1)
}
 0x2bd   :  { %875 = dma.vmem_to_hbm [thread:$0]  %s873_s16, 128, %s1351_s7, [#allocation4]  }
 0x2be   :  { %1173 = dma.done.wait [#allocation4], 128  }
 0x2bf   :  { %1174 = vsyncadd [#allocation4], 4294967168 }
 0x2c0   :  { %879 = vsyncpa [#allocation3], 1 }
 0x2c1   :  { %880 = vsyncpa [#allocation4], 1 }

</bundles_post_ra>
